<compile_context>
chip_gen: v7x
topology: tpu7x:2x2x1
jax: 0.10.0
libtpu: 0.0.40
codegen_flags: <defaults>
</compile_context>

<pallas_src>
import jax
import jax.numpy as jnp
import numpy as np
from jax.experimental import pallas as pl
from jax.experimental.pallas import tpu as pltpu


# ----------------------------------------------------------------------------
# Generic tiled matmul + bias kernel:  out = x @ w + b   (f32 accumulation)
# ----------------------------------------------------------------------------
def matmul_bias_kernel(x_ref, w_ref, b_ref, o_ref, acc_ref):
    @pl.when(pl.program_id(2) == 0)
    def _():
        acc_ref[...] = jnp.zeros_like(acc_ref)

    acc_ref[...] += jnp.dot(x_ref[...], w_ref[...],
                            preferred_element_type=jnp.float32)

    @pl.when(pl.program_id(2) == pl.num_programs(2) - 1)
    def _():
        o_ref[...] = (acc_ref[...] + b_ref[...]).astype(o_ref.dtype)


def _pick_tile(dim, preferred, align):
    """Largest tile t <= preferred with dim % t == 0, preferring t % align == 0.

    Callers pad `dim` so an aligned divisor (or the full extent) always exists;
    this never silently falls back to a huge full-extent block.
    """
    if dim <= preferred:
        return dim
    best_any = None
    for t in range(preferred, 0, -1):
        if dim % t == 0:
            if t % align == 0:
                return t
            if best_any is None:
                best_any = t
    return best_any if best_any is not None else dim


def matmul_bias(x, w, b, *, out_dtype=jnp.float32, tm=256, tn=256, tk=512):
    """x: (M, K), w: (K, N), b: (1, N)  ->  (M, N) in out_dtype."""
    M, K = x.shape
    K2, N = w.shape
    assert K == K2 and b.shape == (1, N)
    tm = _pick_tile(M, tm, 8)
    tn = _pick_tile(N, tn, 128)
    tk = _pick_tile(K, tk, 128)
    grid = (M // tm, N // tn, K // tk)
    return pl.pallas_call(
        matmul_bias_kernel,
        out_shape=jax.ShapeDtypeStruct((M, N), out_dtype),
        grid_spec=pltpu.PrefetchScalarGridSpec(
            num_scalar_prefetch=0,
            grid=grid,
            in_specs=[
                pl.BlockSpec((tm, tk), lambda i, j, k: (i, k)),
                pl.BlockSpec((tk, tn), lambda i, j, k: (k, j)),
                pl.BlockSpec((1, tn), lambda i, j, k: (0, j)),
            ],
            out_specs=pl.BlockSpec((tm, tn), lambda i, j, k: (i, j)),
            scratch_shapes=[pltpu.VMEM((tm, tn), jnp.float32)],
        ),
        compiler_params=pltpu.CompilerParams(
            dimension_semantics=("parallel", "parallel", "arbitrary"),
        ),
    )(x, w, b)


# ----------------------------------------------------------------------------
# LSTM recurrence kernel: consumes precomputed gates_x = x@W_ih^T + b (bf16),
# emits hiddens only.  t_block timesteps per grid step (bounded unroll).
# ----------------------------------------------------------------------------
def lstm_recurrence_kernel(gx_ref, whh_ref, h_out_ref, h_scr, c_scr):
    """
    gx_ref   : (Tt, tb, 4H) bf16  precomputed input-gate term for this block
    whh_ref  : (H, 4H)      bf16  hidden->gates weights (transposed; i,f,g,o)
    h_out_ref: (Tt, tb, H)  bf16  hidden states for this block
    h_scr    : (tb, H)      f32   recurrent hidden state (VMEM scratch)
    c_scr    : (tb, H)      f32   recurrent cell state   (VMEM scratch)
    """
    # New batch block -> reset recurrent state (time is the inner grid axis).
    @pl.when(pl.program_id(1) == 0)
    def _():
        h_scr[...] = jnp.zeros_like(h_scr)
        c_scr[...] = jnp.zeros_like(c_scr)

    H = h_scr.shape[-1]
    whh = whh_ref[...]  # resident bf16 weights (hoisted out of the loop)

    def step(tt, carry):
        h = h_scr[...]
        c = c_scr[...]
        # Only the h-dependent matmul stays on the serial path (bf16 MXU,
        # f32 accumulation); gx already contains x@W_ih + bias (bf16).
        gates = (gx_ref[tt].astype(jnp.float32)
                 + jnp.dot(h.astype(whh.dtype), whh,
                           preferred_element_type=jnp.float32))
        # H is a multiple of 128 -> lane-aligned static gate slices.
        i_g = jax.nn.sigmoid(gates[:, 0 * H:1 * H])
        f_g = jax.nn.sigmoid(gates[:, 1 * H:2 * H])
        g_g = jnp.tanh(gates[:, 2 * H:3 * H])
        o_g = jax.nn.sigmoid(gates[:, 3 * H:4 * H])
        c_new = f_g * c + i_g * g_g          # elementwise stays f32 (v5e-safe)
        h_new = o_g * jnp.tanh(c_new)
        c_scr[...] = c_new
        h_scr[...] = h_new
        h_out_ref[tt] = h_new.astype(h_out_ref.dtype)
        return carry

    # Bounded unroll: amortizes loop overhead without exploding vreg pressure.
    jax.lax.fori_loop(0, gx_ref.shape[0], step, 0, unroll=4)


def lstm_recurrence(gates_x, w_hh_bf16, *, t_block, num_cores=1):
    """gates_x: (T_pad, B_pad, 4H) bf16, w_hh_bf16: (H, 4H) -> (T_pad, B_pad, H) bf16."""
    T_pad, B_pad, G = gates_x.shape
    H = w_hh_bf16.shape[0]
    assert G == 4 * H and T_pad % t_block == 0
    # On 2-TC parts (v7x) split the independent batch rows across cores so the
    # "parallel" grid axis is non-trivial; on 1-TC parts keep M as large as
    # possible per MXU step.
    tb = B_pad
    if num_cores >= 2 and B_pad >= 16 and (B_pad // 2) % 8 == 0:
        tb = B_pad // 2
    grid = (B_pad // tb, T_pad // t_block)
    return pl.pallas_call(
        lstm_recurrence_kernel,
        out_shape=jax.ShapeDtypeStruct((T_pad, B_pad, H), jnp.bfloat16),
        grid_spec=pltpu.PrefetchScalarGridSpec(
            num_scalar_prefetch=0,
            grid=grid,
            in_specs=[
                pl.BlockSpec((t_block, tb, 4 * H), lambda b, t: (t, b, 0)),
                pl.BlockSpec((H, 4 * H), lambda b, t: (0, 0)),
            ],
            out_specs=pl.BlockSpec((t_block, tb, H), lambda b, t: (t, b, 0)),
            scratch_shapes=[
                pltpu.VMEM((tb, H), jnp.float32),  # h
                pltpu.VMEM((tb, H), jnp.float32),  # c
            ],
        ),
        compiler_params=pltpu.CompilerParams(
            # batch independent -> parallel; time is a true recurrence -> arbitrary
            dimension_semantics=("parallel", "arbitrary"),
        ),
    )(gates_x, w_hh_bf16)


# ----------------------------------------------------------------------------
# Full forward pass
# ----------------------------------------------------------------------------
def _round_up(x, m):
    return ((x + m - 1) // m) * m


def _num_tensorcores():
    """Best-effort detection of TensorCores per device (2 on v7x-class parts)."""
    try:
        kind = jax.devices()[0].device_kind.lower()
    except Exception:
        return 1
    return 2 if ("v7" in kind or "7x" in kind) else 1


def decoder_rnn_forward(features, captions, params, *, t_block=16):
    """features: (B, E) f32, captions: (B, Tcap) int32 -> logits (B, Tcap, V) f32."""
    bf16 = jnp.bfloat16
    embed_w = params["embed_w"]          # (V, E)
    w_ih_t = params["w_ih_t"]            # (E, 4H)
    w_hh_t = params["w_hh_t"]            # (H, 4H)
    b_gates = params["b_gates"]          # (1, 4H)
    w_fc_t = params["w_fc_t"]            # (H, V)
    b_fc = params["b_fc"]                # (1, V)

    B, E = features.shape
    H = w_hh_t.shape[0]
    V = w_fc_t.shape[1]

    # --- glue: embedding lookup, building x directly in (T, B, E) order so no
    #     activation transpose is needed before stage 1 (gather stays in JAX).
    cap_ids_tb = jnp.transpose(captions[:, :-1])                      # (T-1, B)
    cap_embed = jnp.take(embed_w, cap_ids_tb, axis=0)                 # (T-1, B, E)
    x_tbE = jnp.concatenate([features[None, :, :], cap_embed], 0)     # (T, B, E)
    T = x_tbE.shape[0]

    # --- padding for lane/sublane-dense tiles:
    #     B -> mult of 16 (bf16 sublane packing), T -> mult of t_block,
    #     E/H/V -> mult of 128 (lane-aligned gate slices & stores).
    B_pad = _round_up(B, 16)
    T_pad = _round_up(T, t_block)
    E_pad = _round_up(E, 128)
    H_pad = _round_up(H, 128)
    V_pad = _round_up(V, 128)

    x_pad = jnp.pad(x_tbE, ((0, T_pad - T), (0, B_pad - B), (0, E_pad - E)))

    # Per-gate zero-padding of H keeps padded hidden lanes identically zero
    # (pre-activation 0 -> g=0, c and h stay 0), so real outputs are unchanged.
    w_ih_pad = jnp.pad(w_ih_t.reshape(E, 4, H),
                       ((0, E_pad - E), (0, 0), (0, H_pad - H))
                       ).reshape(E_pad, 4 * H_pad)
    w_hh_pad = jnp.pad(w_hh_t.reshape(H, 4, H),
                       ((0, H_pad - H), (0, 0), (0, H_pad - H))
                       ).reshape(H_pad, 4 * H_pad)
    b_gates_pad = jnp.pad(b_gates.reshape(1, 4, H),
                          ((0, 0), (0, 0), (0, H_pad - H))
                          ).reshape(1, 4 * H_pad)
    w_fc_pad = jnp.pad(w_fc_t, ((0, H_pad - H), (0, V_pad - V)))
    b_fc_pad = jnp.pad(b_fc, ((0, 0), (0, V_pad - V)))

    # --- Stage 1: gates_x = x @ W_ih^T + b for all timesteps, emitted bf16
    #     (halves the HBM traffic of the recurrence kernel's main stream).
    x2d = x_pad.reshape(T_pad * B_pad, E_pad).astype(bf16)
    gates_x = matmul_bias(x2d, w_ih_pad.astype(bf16), b_gates_pad,
                          out_dtype=bf16)                             # (T*B, 4H) bf16
    gates_x = gates_x.reshape(T_pad, B_pad, 4 * H_pad)

    # --- Stage 2: serial LSTM recurrence (hiddens only)
    hiddens = lstm_recurrence(gates_x, w_hh_pad.astype(bf16),
                              t_block=t_block,
                              num_cores=_num_tensorcores())           # (T, B, H) bf16

    # --- Stage 3: transpose the SMALL bf16 hiddens to (B, T, H), then one
    #     batched (B*T, H_pad) x (H_pad, V_pad) matmul.  The big f32 logits
    #     tensor is never transposed.
    hiddens_bth = jnp.transpose(hiddens, (1, 0, 2))                   # (B, T, H) bf16
    h2d = hiddens_bth.reshape(B_pad * T_pad, H_pad)
    logits2d = matmul_bias(h2d, w_fc_pad.astype(bf16), b_fc_pad)      # (B*T, V_pad) f32

    logits = logits2d.reshape(B_pad, T_pad, V_pad)[:B, :T, :V]        # (B, T, V)
    return logits


# ----------------------------------------------------------------------------
# Pure-JAX reference with bf16 matmul operands / f32 accumulation
# (PyTorch gate order i,f,g,o; combined bias).  Slightly higher precision than
# the kernel (keeps gates_x in f32), so the comparison tolerance is relaxed.
# ----------------------------------------------------------------------------
def reference_forward(features, captions, params):
    bf16 = jnp.bfloat16
    cap_embed = jnp.take(params["embed_w"], captions[:, :-1], axis=0)
    x = jnp.concatenate([features[:, None, :], cap_embed], 1)        # (B, T, E)
    B = x.shape[0]
    H = params["w_hh_t"].shape[0]
    wih = params["w_ih_t"].astype(bf16)
    whh = params["w_hh_t"].astype(bf16)
    wfc = params["w_fc_t"].astype(bf16)

    gx = (jnp.dot(x.astype(bf16), wih, preferred_element_type=jnp.float32)
          + params["b_gates"])                                       # (B, T, 4H) f32

    def step(carry, gx_t):
        h, c = carry
        gates = gx_t + jnp.dot(h.astype(bf16), whh,
                               preferred_element_type=jnp.float32)
        i = jax.nn.sigmoid(gates[:, 0 * H:1 * H])
        f = jax.nn.sigmoid(gates[:, 1 * H:2 * H])
        g = jnp.tanh(gates[:, 2 * H:3 * H])
        o = jax.nn.sigmoid(gates[:, 3 * H:4 * H])
        c_new = f * c + i * g
        h_new = o * jnp.tanh(c_new)
        return (h_new, c_new), h_new

    h0 = jnp.zeros((B, H), jnp.float32)
    c0 = jnp.zeros((B, H), jnp.float32)
    _, hs = jax.lax.scan(step, (h0, c0), jnp.transpose(gx, (1, 0, 2)))
    hs = jnp.transpose(hs, (1, 0, 2))                                # (B, T, H)
    return (jnp.dot(hs.astype(bf16), wfc, preferred_element_type=jnp.float32)
            + params["b_fc"])                                        # (B, T, V)


def init_params(key, embed_size, hidden_size, vocab_size):
    """Deterministic synthetic init matching the module's shapes / init_weights."""
    ks = jax.random.split(key, 7)
    E, H, V = embed_size, hidden_size, vocab_size
    stdv = 1.0 / np.sqrt(H)
    embed_w = jax.random.uniform(ks[0], (V, E), jnp.float32, -0.1, 0.1)
    # PyTorch LSTM params: weight_ih (4H, E), weight_hh (4H, H), biases (4H,)
    w_ih = jax.random.uniform(ks[1], (4 * H, E), jnp.float32, -stdv, stdv)
    w_hh = jax.random.uniform(ks[2], (4 * H, H), jnp.float32, -stdv, stdv)
    b_ih = jax.random.uniform(ks[3], (4 * H,), jnp.float32, -stdv, stdv)
    b_hh = jax.random.uniform(ks[4], (4 * H,), jnp.float32, -stdv, stdv)
    w_fc = jax.random.uniform(ks[5], (V, H), jnp.float32, -0.1, 0.1)
    b_fc = jnp.zeros((V,), jnp.float32)
    return {
        "embed_w": embed_w,
        "w_ih_t": w_ih.T,                        # (E, 4H)
        "w_hh_t": w_hh.T,                        # (H, 4H)
        "b_gates": (b_ih + b_hh)[None, :],       # (1, 4H)
        "w_fc_t": w_fc.T,                        # (H, V)
        "b_fc": b_fc[None, :],                   # (1, V)
    }


# TODO(synk): the autoregressive `sample()` method (greedy decode loop with
# data-dependent early stop) is not implemented; only forward() is kerneled.

if __name__ == "__main__":
    embed_size, hidden_size, vocab_size = 32, 32, 64
    B, T_cap = 2, 8

    key = jax.random.PRNGKey(0)
    k_feat, k_cap, k_par = jax.random.split(key, 3)
    params = init_params(k_par, embed_size, hidden_size, vocab_size)

    features = jax.random.normal(k_feat, (B, embed_size), jnp.float32)
    captions = jax.random.randint(k_cap, (B, T_cap), 0, vocab_size, jnp.int32)

    out = jax.block_until_ready(decoder_rnn_forward(features, captions, params))
    ref = jax.block_until_ready(reference_forward(features, captions, params))

    # Kernel stores gates_x in bf16 (perf review item); reference keeps it f32,
    # so allow a slightly looser tolerance than pure-bit-matching would need.
    np.testing.assert_allclose(np.asarray(out), np.asarray(ref),
                               rtol=1e-2, atol=1e-2)
    assert out.shape == (B, T_cap, vocab_size)

    print("KERNEL_OK")
</pallas_src>

<mosaic_0001>
module attributes {stable_mosaic.version = 11 : i64} {
  func.func @matmul_bias_kernel(%arg0: i32, %arg1: i32, %arg2: i32, %arg3: memref<256x128xbf16, #tpu.memory_space<vmem>>, %arg4: memref<128x256xbf16, #tpu.memory_space<vmem>>, %arg5: memref<1x256xf32, #tpu.memory_space<vmem>>, %arg6: memref<256x256xbf16, #tpu.memory_space<vmem>>, %arg7: memref<256x256xf32, #tpu.memory_space<vmem>>) attributes {dimension_semantics = [#tpu.dimension_semantics<parallel>, #tpu.dimension_semantics<parallel>, #tpu.dimension_semantics<arbitrary>], iteration_bounds = array<i64: 1, 2, 1>, scalar_prefetch = 0 : i64, scratch_operands = 1 : i64, tpu.core_type = #tpu.core_type<tc>, window_params = [{transform_indices = @transform_0, window_bounds = array<i64: 256, 128>}, {transform_indices = @transform_1, window_bounds = array<i64: 128, 256>}, {transform_indices = @transform_2, window_bounds = array<i64: 1, 256>}, {transform_indices = @transform_3, window_bounds = array<i64: 256, 256>}]} {
    %c0_i32 = arith.constant 0 : i32
    %0 = arith.cmpi eq, %arg2, %c0_i32 : i32
    %1 = arith.extui %0 : i1 to i32
    %c0_i32_0 = arith.constant 0 : i32
    %2 = arith.cmpi ne, %1, %c0_i32_0 : i32
    scf.if %2 {
      %cst_10 = arith.constant 0.000000e+00 : f32
      %12 = vector.broadcast %cst_10 : f32 to vector<256x256xf32>
      %c0_11 = arith.constant 0 : index
      %c0_12 = arith.constant 0 : index
      %13 = vector.load %arg7[%c0_11, %c0_12] : memref<256x256xf32, #tpu.memory_space<vmem>>, vector<256x256xf32>
      tpu.vector_store %arg7[%c0_11, %c0_12], %12 {strides = array<i32>} : memref<256x256xf32, #tpu.memory_space<vmem>>, vector<256x256xf32>,
    } else {
    }
    %c0 = arith.constant 0 : index
    %c0_1 = arith.constant 0 : index
    %3 = vector.load %arg7[%c0, %c0_1] : memref<256x256xf32, #tpu.memory_space<vmem>>, vector<256x256xf32>
    %c0_2 = arith.constant 0 : index
    %c0_3 = arith.constant 0 : index
    %4 = vector.load %arg3[%c0_2, %c0_3] : memref<256x128xbf16, #tpu.memory_space<vmem>>, vector<256x128xbf16>
    %c0_4 = arith.constant 0 : index
    %c0_5 = arith.constant 0 : index
    %5 = vector.load %arg4[%c0_4, %c0_5] : memref<128x256xbf16, #tpu.memory_space<vmem>>, vector<128x256xbf16>
    %cst = arith.constant dense<0.000000e+00> : vector<256x256xf32>
    %6 = tpu.matmul %4, %5, %cst {dimension_numbers = #tpu.dot_dimension_numbers<[1], [0], [0], [1], [0, 0, 1, 1], [], []>} : vector<256x128xbf16>, vector<128x256xbf16>, vector<256x256xf32> -> vector<256x256xf32>
    %7 = arith.addf %3, %6 : vector<256x256xf32>
    %c0_6 = arith.constant 0 : index
    %c0_7 = arith.constant 0 : index
    %8 = vector.load %arg7[%c0_6, %c0_7] : memref<256x256xf32, #tpu.memory_space<vmem>>, vector<256x256xf32>
    tpu.vector_store %arg7[%c0_6, %c0_7], %7 {strides = array<i32>} : memref<256x256xf32, #tpu.memory_space<vmem>>, vector<256x256xf32>,
    %c0_i32_8 = arith.constant 0 : i32
    %9 = arith.cmpi eq, %arg2, %c0_i32_8 : i32
    %10 = arith.extui %9 : i1 to i32
    %c0_i32_9 = arith.constant 0 : i32
    %11 = arith.cmpi ne, %10, %c0_i32_9 : i32
    scf.if %11 {
      %c0_10 = arith.constant 0 : index
      %c0_11 = arith.constant 0 : index
      %12 = vector.load %arg7[%c0_10, %c0_11] : memref<256x256xf32, #tpu.memory_space<vmem>>, vector<256x256xf32>
      %c0_12 = arith.constant 0 : index
      %c0_13 = arith.constant 0 : index
      %13 = vector.load %arg5[%c0_12, %c0_13] : memref<1x256xf32, #tpu.memory_space<vmem>>, vector<1x256xf32>
      %14 = vector.broadcast %13 : vector<1x256xf32> to vector<256x256xf32>
      %15 = arith.addf %12, %14 : vector<256x256xf32>
      %16 = arith.truncf %15 : vector<256x256xf32> to vector<256x256xbf16>
      %c0_14 = arith.constant 0 : index
      %c0_15 = arith.constant 0 : index
      %17 = vector.load %arg6[%c0_14, %c0_15] : memref<256x256xbf16, #tpu.memory_space<vmem>>, vector<256x256xbf16>
      tpu.vector_store %arg6[%c0_14, %c0_15], %16 {strides = array<i32>} : memref<256x256xbf16, #tpu.memory_space<vmem>>, vector<256x256xbf16>,
    } else {
    }
    return
  }
  func.func @transform_0(%arg0: i32, %arg1: i32, %arg2: i32) -> (i32, i32) {
    %c0_i32 = arith.constant 0 : i32
    return %arg0, %arg2 : i32, i32
  }
  func.func @transform_1(%arg0: i32, %arg1: i32, %arg2: i32) -> (i32, i32) {
    %c0_i32 = arith.constant 0 : i32
    return %arg2, %arg1 : i32, i32
  }
  func.func @transform_2(%arg0: i32, %arg1: i32, %arg2: i32) -> (i32, i32) {
    %c0_i32 = arith.constant 0 : i32
    %c0_i32_0 = arith.constant 0 : i32
    return %c0_i32, %arg1 : i32, i32
  }
  func.func @transform_3(%arg0: i32, %arg1: i32, %arg2: i32) -> (i32, i32) {
    %c0_i32 = arith.constant 0 : i32
    return %arg0, %arg1 : i32, i32
  }
}

</mosaic_0001>

<bundles_post_ra>
// kernel: tpu_custom_call.1
= control target key start
LH: loop header
LB: loop body
LE: loop exit
PB: predicated region body
PF: predicated region fallthrough
CT: control target
= control target key end

     0   :  { %8 = vsyncpa [#allocation4], 0  ;;  %s2236_s0 = inlined_call_operand.hbm [shape: bf16[256,128], index: 0, kind: input, shape index: {}]   ;;  %s2237_s1 = inlined_call_operand.hbm [shape: bf16[128,512], index: 1, kind: input, shape index: {}]   ;;  %s2238_s2 = inlined_call_operand.vmem [shape: f32[1,512], index: 2, kind: input, shape index: {}]   ;;  %s2239_s3 = inlined_call_operand.hbm [shape: bf16[256,512], index: 3, kind: output, shape index: {}]  }
   0x1   :  { %9 = vsyncpa [#allocation7], 0 }
   0x2   :  { %11 = vsyncpa [#allocation7 + $0x1], 0 }
   0x3   :  { %12 = vsyncpa [#allocation5], 0 }
   0x4   :  { %14 = vsyncpa [#allocation5 + $0x1], 0  ;;  %s1874_s12 = smov 0   ;;  %s1876_s13 = smov 0  }
   0x5   :  { %s1878_s14 = smov 0   ;;  %s1880_s15 = smov 0  }
   0x6   :  { %s1882_s16 = smov 0   ;;  %s1884_s17 = smov 0  }
   0x7 LB: > { %s1442_s18 = sadd.s32 4294967295, %s1840_s17   ;;  %s1443_s19 = sadd.s32 4294967294, %s1840_s17   ;;  %s1840_s17 = sphi %s1884_s17, %s20_s17   ;;  %s1836_s16 = sphi %s1882_s16, %s2265_s16   ;;  %s1832_s15 = sphi %s1880_s15, %s2264_s15   ;;  %s1828_s14 = sphi %s1878_s14, %s2263_s14   ;;  %s1824_s13 = sphi %s1876_s13, %s2262_s13   ;;  %s1820_s12 = sphi %s1874_s12, %s2261_s12  }
   0x8   : > { %p83_p0 = scmp.ne.s32.totalorder %s1828_s14, %s1824_s13  ;;  %p84_p1 = scmp.eq.s32.totalorder %s1840_s17, 0 }
   0x9   : > { %p89_p2 = scmp.ne.s32.totalorder %s1824_s13, %s1820_s12  ;;  %p1911_p3 = scmp.eq.s32.totalorder %s1442_s18, 0 }
   0xa   : > { %p1915_p4 = por %p84_p1, %p83_p0  ;;  %p141_p5 = scmp.eq.s32.totalorder %s1442_s18, 1 }
   0xb   : > { %s2246_s20 = scalar_select %p1911_p3, 1, 0 }
   0xc   : > { %p1921_p6 = por %p1911_p3, %p89_p2  ;;  %p147_p7 = scmp.eq.s32.totalorder %s1443_s19, 1 }
   0xd   : > { %p1925_p8 = por %p141_p5, %p83_p0  ;;  %p1444_p9 = scmp.ge.s32.totalorder %s1840_s17, 1 }
   0xe   : > { %s2248_s22 = scalar_select %p1921_p6, 1, 0 }
   0xf   : > { %s2249_s23 = scalar_select %p1925_p8, 1, 0 }
  0x10   : > { %p1930_p10 = por %p147_p7, %p89_p2  ;;  %p154_p11 = scmp.lt.s32.totalorder %s1840_s17, 3 }
  0x11   : > { %s1842_s26 = smov [#allocation3]   ;;  %p1595_p1 = scmp.lt.s32.totalorder %s1840_s17, 2 }
  0x12   : > { %s2250_s24 = scalar_select %p1930_p10, 1, 0 }
  0x13   : > { %p1935_p12 = pnand %p1444_p9, %p154_p11  ;;  %s170_s27 = sshll.u32 %s1842_s26, 4  ;;  %s1939_s27 = int_to_ptr.vmem [resolvable:$true] %s170_s27 }
  0x14   : > { %p1953_p2 = pnand %p1595_p1, %p1915_p4  ;;  %s35_s30 = sadd.s32 1, %s1836_s16 }
  0x15   : > { %s2251_s25 = scalar_select %p1935_p12, 1, 0 }
  0x16   : > { %p1582_p13 = pneg %p1935_p12  ;;  %s1696_s6 = scalar_lea.hbm %s2236_s0, 2048 }
  0x17   : > { %s2253_s29 = scalar_select %p1953_p2, 1, 0 }
  0x18   : > { %p1947_p5 = pnand %p1582_p13, %p1911_p3  ;;  %p1697_p7 = scmp.ne.s32.totalorder %s2236_s0, %s1696_s6 }
  0x19   : > { %p1703_p4 = scmp.lt.u32.totalorder %s1696_s6, %s2236_s0 }
  0x1a   : > { %p1698_p9 = pneg %p1947_p5 }
  0x1c   : > { %p1699_p11 = pnand %p1698_p9, %p1697_p7 }
  0x1e   : > { %p1700_p13 = pneg %p1699_p11 }
  0x20   : > { %p1705_p1 = pnand %p1703_p4, %p1700_p13 }
  0x22   : > { %1708 = shalt.err (!%p1705_p1)
}
  0x23   : > { %s1709_s11 = scalar_lea.vmem %s1939_s27, 2048  ;;  %p1717_p6 = scmp.lt.s32.totalorder %s1939_s27, %s1939_s27 }
  0x24   : > { %p1710_p0 = scmp.ne.s32.totalorder %s1939_s27, %s1709_s11  ;;  %p1718_p3 = scmp.lt.s32.totalorder %s1709_s11, %s1709_s11 }
  0x26   : > { %p1712_p10 = pnand %p1710_p0, %p1698_p9  ;;  %p1719_p12 = por %p1718_p3, %p1717_p6 }
  0x28   : > { %p1713_p8 = pneg %p1712_p10 }
  0x2a   : > { %p1720_p2 = pnand %p1719_p12, %p1713_p8 }
  0x2c   : > { %1723 = shalt.err (!%p1720_p2)
}
  0x2d   : > { %s1843_s18 = smov 64   ;;  %s1844_s19 = smov 4  }
  0x2e   : > { %1585 = dma.hbm_to_vmem [thread:$0]  (!%p1947_p5), %s2236_s0, 2048, %s1939_s27, [#allocation4], %s1843_s18, %s1843_s18, %s1844_s19  }
  0x2f   : > { %p37_p10 = scmp.ge.s32.totalorder %s35_s30, 2  ;;  %s76_s4 = sadd.s32 1, %s1828_s14 }
  0x30   : > { %s184_s5 = sand.u32 1, %s1828_s14   ;;  %s1524_s8 = sshll.u32 %s1836_s16, 7 }
  0x31   : > { %s2267_s30 = smov (%p37_p10, %s35_s30), 0  ;;  %s1447_s6 = sshll.u32 %s184_s5, 7 }
  0x32   : > { %s72_s7 = ssub.s32 %s1836_s16, %s2267_s30  ;;  %s1989_s28 = scalar_lea.hbm %s2237_s1, %s1524_s8 }
  0x33   : > { %p74_p3 = scmp.eq.s32.totalorder %s72_s7, 0  ;;  %s188_s27 = scalar_lea.vmem [#allocation6], %s1447_s6 }
  0x34   : > { %s198_s11 = sshll.u32 %s188_s27, 4  ;;  %s1996_s19 = scalar_lea.sflag [#allocation7], %s184_s5  ;;  %s1994_s11 = int_to_ptr.vmem [resolvable:$true] %s198_s11 }
  0x35   : > { %s1992_s18 = scalar_select %p74_p3, %s1828_s14, %s76_s4  }
  0x36   : > { %s1724_s21 = scalar_lea.hbm %s1989_s28, 2048  ;;  %p2254_p8 = scmp.ne.s32.totalorder %s2253_s29, 0 }
  0x37   : > { %p1725_p6 = scmp.ne.s32.totalorder %s1989_s28, %s1724_s21  ;;  %s1729_s8 = scalar_lea.hbm %s2237_s1, 4096 }
  0x38   : > { %p1726_p12 = pneg %p2254_p8  ;;  %p1730_p2 = scmp.lt.u32.totalorder %s1989_s28, %s2237_s1 }
  0x39   : > { %p1731_p7 = scmp.lt.u32.totalorder %s1729_s8, %s1724_s21  ;;  %p1733_p11 = scmp.lt.u32.totalorder %s1724_s21, %s1989_s28 }
  0x3a   : > { %p1727_p0 = pnand %p1726_p12, %p1725_p6 }
  0x3b   : > { %p1732_p9 = por %p1731_p7, %p1730_p2 }
  0x3c   : > { %p1728_p5 = pneg %p1727_p0 }
  0x3d   : > { %p1734_p13 = por %p1733_p11, %p1732_p9 }
  0x3f   : > { %p1735_p4 = pnand %p1734_p13, %p1728_p5 }
  0x41   : > { %1738 = shalt.err (!%p1735_p4)
}
  0x42   : > { %s1739_s4 = scalar_lea.vmem %s1994_s11, 2048  ;;  %s1845_s5 = smov [#allocation6]  }
  0x43   : > { %p1740_p1 = scmp.ne.s32.totalorder %s1994_s11, %s1739_s4  ;;  %s1744_s10 = sshll.u32 %s1845_s5, 4  ;;  %s1745_s10 = int_to_ptr.vmem [resolvable:$false] %s1744_s10 }
  0x44   : > { %s1746_s27 = scalar_lea.vmem %s1745_s10, 4096  ;;  %p1747_p6 = scmp.lt.s32.totalorder %s1994_s11, %s1745_s10 }
  0x45   : > { %p1742_p10 = pnand %p1740_p1, %p1726_p12  ;;  %p1748_p0 = scmp.lt.s32.totalorder %s1746_s27, %s1739_s4 }
  0x47   : > { %p1743_p3 = pneg %p1742_p10  ;;  %p1749_p2 = por %p1748_p0, %p1747_p6 }
  0x49   : > { %p1750_p7 = pnand %p1749_p2, %p1743_p3 }
  0x4b   : > { %1753 = shalt.err (!%p1750_p7)
}
  0x4c   : > { %s1846_s21 = smov 256   ;;  %s1847_s26 = smov 128  }
  0x4d   : > { %s1848_s7 = smov 8   ;;  %p2255_p12 = scmp.ne.s32.totalorder %s2251_s25, 0 }
  0x4e   : > { %1589 = dma.hbm_to_vmem [thread:$0]  (!%p2254_p8), %s1989_s28, 2048, %s1994_s11, %s1996_s19, %s1846_s21, %s1847_s26, %s1848_s7  }
  0x4f   : > { %218 = sbr.rel (%p2255_p12) target bundleno = 416 (0x1a0), region = 32  ;;  %p2256_p5 = scmp.ne.s32.totalorder (!%p2255_p12), %s2246_s20, 0 }
  0x56   : > { %1807 = dma.done.wait (%p2256_p5), [#allocation4], 2048  }
  0x57   : > { %1809 = vsyncadd (%p2256_p5), [#allocation4], 4294965248  ;;  %s2031_s8 = sand.u32 1, %s1824_s13   ;;  %p2257_p8 = scmp.ne.s32.totalorder %s2248_s22, 0 }
  0x58   : > { %s1452_s6 = sshll.u32 %s2031_s8, 7  ;;  %s225_s9 = scalar_lea.sflag [#allocation7], %s2031_s8 }
  0x59   : > { %s2035_s4 = scalar_lea.vmem [#allocation6], %s1452_s6 }
  0x5a   : > { %1811 = dma.done.wait (%p2257_p8), %s225_s9, 2048  }
  0x5b   : > { %1813 = vsyncadd (%p2257_p8), %s225_s9, 4294965248  ;;  %v1849_v0 = vmov 0   ;;  %v1656_v1 = vld [vmem:[%s2035_s4 + $0x4] ss:$8 sps:$4 sm:$0xff]   ;;  %v1658_v2 = vld [vmem:[%s2035_s4] ss:$8 sps:$4 sm:$0xff]   ;;  %v1012_v33 = vlaneseq }
  0x5c   : > { %654 = vmatprep.mubr.bf16.mxu0 %v1849_v0  ;;  %734 = vmatprep.mubr.bf16.mxu1 %v1849_v0  ;;  %v1659_v3 = vld [vmem:[%s2035_s4 + $0x14] ss:$8 sps:$4 sm:$0xff]   ;;  %v1661_v4 = vld [vmem:[%s2035_s4 + $0x10] ss:$8 sps:$4 sm:$0xff]   ;;  %v1662_v5 = vld [vmem:[%s2035_s4 + $0x24] ss:$8 sps:$4 sm:$0xff]  }
  0x5d   : > { %622 = vmatprep.subr.bf16.mxu0 %v1656_v1  ;;  %1558 = vmatprep.subr.bf16.mxu1 %v1656_v1  ;;  %v1664_v6 = vld [vmem:[%s2035_s4 + $0x20] ss:$8 sps:$4 sm:$0xff]   ;;  %v1665_v7 = vld [vmem:[%s2035_s4 + $0x34] ss:$8 sps:$4 sm:$0xff]   ;;  %v1667_v8 = vld [vmem:[%s2035_s4 + $0x30] ss:$8 sps:$4 sm:$0xff]  }
  0x5e   : > { %623 = vmatpush1.bf16.msra.mxu0 %v1658_v2  ;;  %1566 = vmatpush1.bf16.msra.mxu1 %v1658_v2  ;;  %v1668_v9 = vld [vmem:[%s2035_s4 + $0x44] ss:$8 sps:$4 sm:$0xff]   ;;  %v1670_v10 = vld [vmem:[%s2035_s4 + $0x40] ss:$8 sps:$4 sm:$0xff]   ;;  %v1671_v11 = vld [vmem:[%s2035_s4 + $0x54] ss:$8 sps:$4 sm:$0xff]  }
  0x5f   : > { %624 = vmatprep.subr.bf16.mxu0 %v1659_v3  ;;  %1559 = vmatprep.subr.bf16.mxu1 %v1659_v3  ;;  %v1673_v12 = vld [vmem:[%s2035_s4 + $0x50] ss:$8 sps:$4 sm:$0xff]   ;;  %v1674_v13 = vld [vmem:[%s2035_s4 + $0x64] ss:$8 sps:$4 sm:$0xff]   ;;  %v1676_v14 = vld [vmem:[%s2035_s4 + $0x60] ss:$8 sps:$4 sm:$0xff]  }
  0x60   : > { %v1677_v15 = vld [vmem:[%s2035_s4 + $0x74] ss:$8 sps:$4 sm:$0xff]   ;;  %v1679_v16 = vld [vmem:[%s2035_s4 + $0x70] ss:$8 sps:$4 sm:$0xff]   ;;  %v1680_v17 = vld [vmem:[#allocation3] sm:$0xff]   ;;  %s1454_s20 = sshll.u32 %s1832_s15, 1 }
  0x61   : > { %v1681_v18 = vld [vmem:[#allocation3 + $0x40] sm:$0xff]   ;;  %v1682_v19 = vld [vmem:[#allocation3 + $0x8] sm:$0xff]   ;;  %v1684_v21 = vld [vmem:[#allocation3 + $0x10] sm:$0xff]   ;;  %p259_p9 = scmp.lt.s32.totalorder %s1454_s20, 3  ;;  %v1013_v34 = vshrl.u32 %v1012_v33, 7  ;;  %s1453_s28 = sshll.u32 %s2031_s8, 8 }
  0x62   : > { %625 = vmatpush1.bf16.msra.mxu0 %v1661_v4  ;;  %1567 = vmatpush1.bf16.msra.mxu1 %v1661_v4  ;;  %v1683_v20 = vld [vmem:[#allocation3 + $0x48] sm:$0xff]   ;;  %v1685_v22 = vld [vmem:[#allocation3 + $0x50] sm:$0xff]   ;;  %v1686_v23 = vld [vmem:[#allocation3 + $0x18] sm:$0xff]   ;;  %s2090_s11 = scalar_lea.vmem [#allocation8], %s1453_s28  ;;  %s1557_s19 = sshll.u32 %s1832_s15, 7 }
  0x63   : > { %626 = vmatprep.subr.bf16.mxu0 %v1662_v5  ;;  %1560 = vmatprep.subr.bf16.mxu1 %v1662_v5  ;;  %v1687_v24 = vld [vmem:[#allocation3 + $0x58] sm:$0xff]   ;;  %v1688_v25 = vld [vmem:[#allocation3 + $0x20] sm:$0xff]   ;;  %v1690_v27 = vld [vmem:[#allocation3 + $0x28] sm:$0xff]   ;;  %s2269_s20 = smov (!%p259_p9, %s1454_s20), 3  ;;  %v1014_v35 = vsub.s32 0, %v1013_v34  ;;  %v1018_v37 = vsub.s32 1, %v1013_v34  ;;  %s2181_s27 = scalar_lea.hbm %s2239_s3, %s1557_s19 }
  0x64   : > { %v1689_v26 = vld [vmem:[#allocation3 + $0x60] sm:$0xff]   ;;  %v1691_v28 = vld [vmem:[#allocation3 + $0x68] sm:$0xff]   ;;  %v1692_v29 = vld [vmem:[#allocation3 + $0x30] sm:$0xff]   ;;  %s261_s29 = scalar_lea.vmem %s2238_s2, %s2269_s20  ;;  %s1327_s5 = sshll.u32 %s2090_s11, 4  ;;  %s2183_s5 = int_to_ptr.vmem [resolvable:$true] %s1327_s5 }
  0x65   : > { %v1693_v30 = vld [vmem:[#allocation3 + $0x70] sm:$0xff]   ;;  %v1694_v31 = vld [vmem:[#allocation3 + $0x38] sm:$0xff]   ;;  %v1010_v36 = vld [vmem:[%s261_s29] sm:$0x3]  ;;  %s1311_s21 = scalar_lea.sflag [#allocation5], %s2031_s8  ;;  %s1754_s26 = scalar_lea.vmem %s2183_s5, 4096 }
  0x66   : > { %627 = vmatpush1.bf16.msra.mxu0 %v1664_v6  ;;  %1568 = vmatpush1.bf16.msra.mxu1 %v1664_v6  ;;  %v1695_v32 = vld [vmem:[#allocation3 + $0x78] sm:$0xff]   ;;  %v2077_v38 = vrot.slane %v1010_v36, %v1014_v35  ;;  %v2079_v39 = vrot.slane %v1010_v36, %v1018_v37  ;;  %p1755_p11 = scmp.ne.s32.totalorder %s2183_s5, %s1754_s26  ;;  %p2258_p13 = scmp.ne.s32.totalorder %s2249_s23, 0 }
  0x67   : > { %628 = vmatprep.subr.bf16.mxu0 %v1665_v7  ;;  %1561 = vmatprep.subr.bf16.mxu1 %v1665_v7  ;;  %s1850_s7 = smov [#allocation8]  }
  0x68   : > { %p1756_p4 = pnand %p1755_p11, %p2258_p13  ;;  %s1758_s6 = sshll.u32 %s1850_s7, 4  ;;  %s1759_s6 = int_to_ptr.vmem [resolvable:$false] %s1758_s6 }
  0x69   : > { %s1760_s9 = scalar_lea.vmem %s1759_s6, 8192  ;;  %p1761_p10 = scmp.lt.s32.totalorder %s2183_s5, %s1759_s6 }
  0x6a   : > { %629 = vmatpush1.bf16.msra.mxu0 %v1667_v8  ;;  %1569 = vmatpush1.bf16.msra.mxu1 %v1667_v8  ;;  %p1757_p1 = pneg %p1756_p4  ;;  %p1762_p3 = scmp.lt.s32.totalorder %s1760_s9, %s1754_s26 }
  0x6b   : > { %630 = vmatprep.subr.bf16.mxu0 %v1668_v9  ;;  %1562 = vmatprep.subr.bf16.mxu1 %v1668_v9 }
  0x6c   : > { %p1763_p6 = por %p1762_p3, %p1761_p10 }
  0x6e   : > { %631 = vmatpush1.bf16.msra.mxu0 %v1670_v10  ;;  %1570 = vmatpush1.bf16.msra.mxu1 %v1670_v10  ;;  %p1764_p0 = pnand %p1763_p6, %p1757_p1 }
  0x6f   : > { %632 = vmatprep.subr.bf16.mxu0 %v1671_v11  ;;  %1563 = vmatprep.subr.bf16.mxu1 %v1671_v11 }
  0x72   : > { %633 = vmatpush1.bf16.msra.mxu0 %v1673_v12  ;;  %1571 = vmatpush1.bf16.msra.mxu1 %v1673_v12 }
  0x73   : > { %634 = vmatprep.subr.bf16.mxu0 %v1674_v13  ;;  %1564 = vmatprep.subr.bf16.mxu1 %v1674_v13 }
  0x76   : > { %635 = vmatpush1.bf16.msra.mxu0 %v1676_v14  ;;  %1572 = vmatpush1.bf16.msra.mxu1 %v1676_v14 }
  0x77   : > { %636 = vmatprep.subr.bf16.mxu0 %v1677_v15  ;;  %1565 = vmatprep.subr.bf16.mxu1 %v1677_v15 }
  0x7a   : > { %637 = vmatpush1.bf16.msra.mxu0 %v1679_v16  ;;  %1573 = vmatpush1.bf16.msra.mxu1 %v1679_v16 }
  0x7d   : > { %655 = vmatmul.mubr.bf16.vlgmr.msra.gmra.mrb[0].mxu0 %v1680_v17  ;;  %735 = vmatmul.mubr.bf16.vlgmr.msra.gmra.mrb[0].mxu1 %v1681_v18 }
  0x7e   : > { %664 = vmatprep.mubr.bf16.mxu0 %v1849_v0  ;;  %744 = vmatprep.mubr.bf16.mxu1 %v1849_v0 }
  0x85   : > { %665 = vmatmul.mubr.bf16.gmra.mrb[4].mxu0 %v1682_v19  ;;  %745 = vmatmul.mubr.bf16.gmra.mrb[4].mxu1 %v1683_v20 }
  0x86   : > { %674 = vmatprep.mubr.bf16.mxu0 %v1849_v0  ;;  %754 = vmatprep.mubr.bf16.mxu1 %v1849_v0 }
  0x8d   : > { %675 = vmatmul.mubr.bf16.gmra.mrb[8].mxu0 %v1684_v21  ;;  %755 = vmatmul.mubr.bf16.gmra.mrb[8].mxu1 %v1685_v22 }
  0x8e   : > { %684 = vmatprep.mubr.bf16.mxu0 %v1849_v0  ;;  %764 = vmatprep.mubr.bf16.mxu1 %v1849_v0 }
  0x95   : > { %685 = vmatmul.mubr.bf16.gmra.mrb[12].mxu0 %v1686_v23  ;;  %765 = vmatmul.mubr.bf16.gmra.mrb[12].mxu1 %v1687_v24 }
  0x96   : > { %694 = vmatprep.mubr.bf16.mxu0 %v1849_v0  ;;  %774 = vmatprep.mubr.bf16.mxu1 %v1849_v0 }
  0x9d   : > { %695 = vmatmul.mubr.bf16.gmra.mrb[16].mxu0 %v1688_v25  ;;  %775 = vmatmul.mubr.bf16.gmra.mrb[16].mxu1 %v1689_v26 }
  0x9e   : > { %704 = vmatprep.mubr.bf16.mxu0 %v1849_v0  ;;  %784 = vmatprep.mubr.bf16.mxu1 %v1849_v0 }
  0xa5   : > { %705 = vmatmul.mubr.bf16.gmra.mrb[20].mxu0 %v1690_v27  ;;  %785 = vmatmul.mubr.bf16.gmra.mrb[20].mxu1 %v1691_v28 }
  0xa6   : > { %714 = vmatprep.mubr.bf16.mxu0 %v1849_v0  ;;  %794 = vmatprep.mubr.bf16.mxu1 %v1849_v0 }
  0xad   : > { %715 = vmatmul.mubr.bf16.gmra.mrb[24].mxu0 %v1692_v29  ;;  %795 = vmatmul.mubr.bf16.gmra.mrb[24].mxu1 %v1693_v30 }
  0xae   : > { %724 = vmatprep.mubr.bf16.mxu0 %v1849_v0  ;;  %804 = vmatprep.mubr.bf16.mxu1 %v1849_v0 }
  0xb5   : > { %725 = vmatmul.mubr.bf16.gmra.mrb[28].mxu0 %v1694_v31  ;;  %805 = vmatmul.mubr.bf16.gmra.mrb[28].mxu1 %v1695_v32 }
 0x150   : > { %v656_v40 = vpop.f32.mrb[0].mxu0  ;;  %v736_v41 = vpop.f32.mrb[0].mxu1 }
 0x151   : > { %v1022_v42 = vadd.f32 %v2077_v38, %v656_v40  ;;  %v1054_v43 = vadd.f32 %v2077_v38, %v736_v41  ;;  %v658_v44 = vpop.f32.mrb[1].mxu0  ;;  %v738_v45 = vpop.f32.mrb[1].mxu1 }
 0x152   : > { %v1023_v46 = vadd.f32 %v2079_v39, %v658_v44  ;;  %v1055_v47 = vadd.f32 %v2079_v39, %v738_v45  ;;  %v660_v48 = vpop.f32.mrb[2].mxu0  ;;  %v740_v49 = vpop.f32.mrb[2].mxu1 }
 0x153   : > { %v1024_v50 = vadd.f32 %v2077_v38, %v660_v48  ;;  %v1056_v51 = vadd.f32 %v2077_v38, %v740_v49  ;;  %v662_v52 = vpop.f32.mrb[3].mxu0  ;;  %v742_v53 = vpop.f32.mrb[3].mxu1 }
 0x154   : > { %v1525_v54 = vpack.c.bf16 %v1023_v46, %v1022_v42  ;;  %v1541_v55 = vpack.c.bf16 %v1055_v47, %v1054_v43  ;;  %v1025_v56 = vadd.f32 %v2079_v39, %v662_v52  ;;  %v1057_v57 = vadd.f32 %v2079_v39, %v742_v53 }
 0x156   : > { %1278 = vst [vmem:[%s2090_s11] sm:$0xff] %v1525_v54  ;;  %1294 = vst [vmem:[%s2090_s11 + $0x80] sm:$0xff] %v1541_v55  ;;  %v1526_v58 = vpack.c.bf16 %v1025_v56, %v1024_v50  ;;  %v1542_v59 = vpack.c.bf16 %v1057_v57, %v1056_v51 }
 0x158   : > { %1279 = vst [vmem:[%s2090_s11 + $0x8] sm:$0xff] %v1526_v58  ;;  %1295 = vst [vmem:[%s2090_s11 + $0x88] sm:$0xff] %v1542_v59  ;;  %v666_v60 = vpop.f32.mrb[4].mxu0  ;;  %v746_v61 = vpop.f32.mrb[4].mxu1 }
 0x159   : > { %v1026_v62 = vadd.f32 %v2077_v38, %v666_v60  ;;  %v1058_v63 = vadd.f32 %v2077_v38, %v746_v61  ;;  %v668_v0 = vpop.f32.mrb[5].mxu0  ;;  %v748_v1 = vpop.f32.mrb[5].mxu1 }
 0x15a   : > { %v1027_v2 = vadd.f32 %v2079_v39, %v668_v0  ;;  %v1059_v3 = vadd.f32 %v2079_v39, %v748_v1  ;;  %v670_v4 = vpop.f32.mrb[6].mxu0  ;;  %v750_v5 = vpop.f32.mrb[6].mxu1 }
 0x15b   : > { %v1028_v6 = vadd.f32 %v2077_v38, %v670_v4  ;;  %v1060_v7 = vadd.f32 %v2077_v38, %v750_v5  ;;  %v672_v8 = vpop.f32.mrb[7].mxu0  ;;  %v752_v9 = vpop.f32.mrb[7].mxu1 }
 0x15c   : > { %v1527_v10 = vpack.c.bf16 %v1027_v2, %v1026_v62  ;;  %v1543_v11 = vpack.c.bf16 %v1059_v3, %v1058_v63  ;;  %v1029_v12 = vadd.f32 %v2079_v39, %v672_v8  ;;  %v1061_v13 = vadd.f32 %v2079_v39, %v752_v9 }
 0x15e   : > { %1280 = vst [vmem:[%s2090_s11 + $0x10] sm:$0xff] %v1527_v10  ;;  %1296 = vst [vmem:[%s2090_s11 + $0x90] sm:$0xff] %v1543_v11  ;;  %v1528_v14 = vpack.c.bf16 %v1029_v12, %v1028_v6  ;;  %v1544_v15 = vpack.c.bf16 %v1061_v13, %v1060_v7 }
 0x160   : > { %1281 = vst [vmem:[%s2090_s11 + $0x18] sm:$0xff] %v1528_v14  ;;  %1297 = vst [vmem:[%s2090_s11 + $0x98] sm:$0xff] %v1544_v15  ;;  %v676_v16 = vpop.f32.mrb[8].mxu0  ;;  %v756_v17 = vpop.f32.mrb[8].mxu1 }
 0x161   : > { %v1030_v18 = vadd.f32 %v2077_v38, %v676_v16  ;;  %v1062_v19 = vadd.f32 %v2077_v38, %v756_v17  ;;  %v678_v20 = vpop.f32.mrb[9].mxu0  ;;  %v758_v21 = vpop.f32.mrb[9].mxu1 }
 0x162   : > { %v1031_v22 = vadd.f32 %v2079_v39, %v678_v20  ;;  %v1063_v23 = vadd.f32 %v2079_v39, %v758_v21  ;;  %v680_v24 = vpop.f32.mrb[10].mxu0  ;;  %v760_v25 = vpop.f32.mrb[10].mxu1 }
 0x163   : > { %v1032_v26 = vadd.f32 %v2077_v38, %v680_v24  ;;  %v1064_v27 = vadd.f32 %v2077_v38, %v760_v25  ;;  %v682_v28 = vpop.f32.mrb[11].mxu0  ;;  %v762_v29 = vpop.f32.mrb[11].mxu1 }
 0x164   : > { %v1529_v30 = vpack.c.bf16 %v1031_v22, %v1030_v18  ;;  %v1545_v31 = vpack.c.bf16 %v1063_v23, %v1062_v19  ;;  %v1033_v32 = vadd.f32 %v2079_v39, %v682_v28  ;;  %v1065_v33 = vadd.f32 %v2079_v39, %v762_v29 }
 0x166   : > { %1282 = vst [vmem:[%s2090_s11 + $0x20] sm:$0xff] %v1529_v30  ;;  %1298 = vst [vmem:[%s2090_s11 + $0xa0] sm:$0xff] %v1545_v31  ;;  %v1530_v34 = vpack.c.bf16 %v1033_v32, %v1032_v26  ;;  %v1546_v35 = vpack.c.bf16 %v1065_v33, %v1064_v27 }
 0x168   : > { %1283 = vst [vmem:[%s2090_s11 + $0x28] sm:$0xff] %v1530_v34  ;;  %1299 = vst [vmem:[%s2090_s11 + $0xa8] sm:$0xff] %v1546_v35  ;;  %v686_v36 = vpop.f32.mrb[12].mxu0  ;;  %v766_v37 = vpop.f32.mrb[12].mxu1 }
 0x169   : > { %v1034_v40 = vadd.f32 %v2077_v38, %v686_v36  ;;  %v1066_v41 = vadd.f32 %v2077_v38, %v766_v37  ;;  %v688_v42 = vpop.f32.mrb[13].mxu0  ;;  %v768_v43 = vpop.f32.mrb[13].mxu1 }
 0x16a   : > { %v1035_v44 = vadd.f32 %v2079_v39, %v688_v42  ;;  %v1067_v45 = vadd.f32 %v2079_v39, %v768_v43  ;;  %v690_v46 = vpop.f32.mrb[14].mxu0  ;;  %v770_v47 = vpop.f32.mrb[14].mxu1 }
 0x16b   : > { %v1036_v48 = vadd.f32 %v2077_v38, %v690_v46  ;;  %v1068_v49 = vadd.f32 %v2077_v38, %v770_v47  ;;  %v692_v50 = vpop.f32.mrb[15].mxu0  ;;  %v772_v51 = vpop.f32.mrb[15].mxu1 }
 0x16c   : > { %v1531_v52 = vpack.c.bf16 %v1035_v44, %v1034_v40  ;;  %v1547_v53 = vpack.c.bf16 %v1067_v45, %v1066_v41  ;;  %v1037_v54 = vadd.f32 %v2079_v39, %v692_v50  ;;  %v1069_v55 = vadd.f32 %v2079_v39, %v772_v51 }
 0x16e   : > { %1284 = vst [vmem:[%s2090_s11 + $0x30] sm:$0xff] %v1531_v52  ;;  %1300 = vst [vmem:[%s2090_s11 + $0xb0] sm:$0xff] %v1547_v53  ;;  %v1532_v56 = vpack.c.bf16 %v1037_v54, %v1036_v48  ;;  %v1548_v57 = vpack.c.bf16 %v1069_v55, %v1068_v49 }
 0x170   : > { %1285 = vst [vmem:[%s2090_s11 + $0x38] sm:$0xff] %v1532_v56  ;;  %1301 = vst [vmem:[%s2090_s11 + $0xb8] sm:$0xff] %v1548_v57  ;;  %v696_v58 = vpop.f32.mrb[16].mxu0  ;;  %v776_v59 = vpop.f32.mrb[16].mxu1 }
 0x171   : > { %v1038_v60 = vadd.f32 %v2077_v38, %v696_v58  ;;  %v1070_v61 = vadd.f32 %v2077_v38, %v776_v59  ;;  %v698_v62 = vpop.f32.mrb[17].mxu0  ;;  %v778_v63 = vpop.f32.mrb[17].mxu1 }
 0x172   : > { %v1039_v0 = vadd.f32 %v2079_v39, %v698_v62  ;;  %v1071_v1 = vadd.f32 %v2079_v39, %v778_v63  ;;  %v700_v2 = vpop.f32.mrb[18].mxu0  ;;  %v780_v3 = vpop.f32.mrb[18].mxu1 }
 0x173   : > { %v1040_v4 = vadd.f32 %v2077_v38, %v700_v2  ;;  %v1072_v5 = vadd.f32 %v2077_v38, %v780_v3  ;;  %v702_v6 = vpop.f32.mrb[19].mxu0  ;;  %v782_v7 = vpop.f32.mrb[19].mxu1 }
 0x174   : > { %v1533_v8 = vpack.c.bf16 %v1039_v0, %v1038_v60  ;;  %v1549_v9 = vpack.c.bf16 %v1071_v1, %v1070_v61  ;;  %v1041_v10 = vadd.f32 %v2079_v39, %v702_v6  ;;  %v1073_v11 = vadd.f32 %v2079_v39, %v782_v7 }
 0x176   : > { %1286 = vst [vmem:[%s2090_s11 + $0x40] sm:$0xff] %v1533_v8  ;;  %1302 = vst [vmem:[%s2090_s11 + $0xc0] sm:$0xff] %v1549_v9  ;;  %v1534_v12 = vpack.c.bf16 %v1041_v10, %v1040_v4  ;;  %v1550_v13 = vpack.c.bf16 %v1073_v11, %v1072_v5 }
 0x178   : > { %1287 = vst [vmem:[%s2090_s11 + $0x48] sm:$0xff] %v1534_v12  ;;  %1303 = vst [vmem:[%s2090_s11 + $0xc8] sm:$0xff] %v1550_v13  ;;  %v706_v14 = vpop.f32.mrb[20].mxu0  ;;  %v786_v15 = vpop.f32.mrb[20].mxu1 }
 0x179   : > { %v1042_v16 = vadd.f32 %v2077_v38, %v706_v14  ;;  %v1074_v17 = vadd.f32 %v2077_v38, %v786_v15  ;;  %v708_v18 = vpop.f32.mrb[21].mxu0  ;;  %v788_v19 = vpop.f32.mrb[21].mxu1 }
 0x17a   : > { %v1043_v20 = vadd.f32 %v2079_v39, %v708_v18  ;;  %v1075_v21 = vadd.f32 %v2079_v39, %v788_v19  ;;  %v710_v22 = vpop.f32.mrb[22].mxu0  ;;  %v790_v23 = vpop.f32.mrb[22].mxu1 }
 0x17b   : > { %v1044_v24 = vadd.f32 %v2077_v38, %v710_v22  ;;  %v1076_v25 = vadd.f32 %v2077_v38, %v790_v23  ;;  %v712_v26 = vpop.f32.mrb[23].mxu0  ;;  %v792_v27 = vpop.f32.mrb[23].mxu1 }
 0x17c   : > { %v1535_v28 = vpack.c.bf16 %v1043_v20, %v1042_v16  ;;  %v1551_v29 = vpack.c.bf16 %v1075_v21, %v1074_v17  ;;  %v1045_v30 = vadd.f32 %v2079_v39, %v712_v26  ;;  %v1077_v31 = vadd.f32 %v2079_v39, %v792_v27 }
 0x17e   : > { %1288 = vst [vmem:[%s2090_s11 + $0x50] sm:$0xff] %v1535_v28  ;;  %1304 = vst [vmem:[%s2090_s11 + $0xd0] sm:$0xff] %v1551_v29  ;;  %v1536_v32 = vpack.c.bf16 %v1045_v30, %v1044_v24  ;;  %v1552_v33 = vpack.c.bf16 %v1077_v31, %v1076_v25 }
 0x180   : > { %1289 = vst [vmem:[%s2090_s11 + $0x58] sm:$0xff] %v1536_v32  ;;  %1305 = vst [vmem:[%s2090_s11 + $0xd8] sm:$0xff] %v1552_v33  ;;  %v716_v34 = vpop.f32.mrb[24].mxu0  ;;  %v796_v35 = vpop.f32.mrb[24].mxu1 }
 0x181   : > { %v1046_v36 = vadd.f32 %v2077_v38, %v716_v34  ;;  %v1078_v37 = vadd.f32 %v2077_v38, %v796_v35  ;;  %v718_v40 = vpop.f32.mrb[25].mxu0  ;;  %v798_v41 = vpop.f32.mrb[25].mxu1 }
 0x182   : > { %v1047_v42 = vadd.f32 %v2079_v39, %v718_v40  ;;  %v1079_v43 = vadd.f32 %v2079_v39, %v798_v41  ;;  %v720_v44 = vpop.f32.mrb[26].mxu0  ;;  %v800_v45 = vpop.f32.mrb[26].mxu1 }
 0x183   : > { %v1048_v46 = vadd.f32 %v2077_v38, %v720_v44  ;;  %v1080_v47 = vadd.f32 %v2077_v38, %v800_v45  ;;  %v722_v48 = vpop.f32.mrb[27].mxu0  ;;  %v802_v49 = vpop.f32.mrb[27].mxu1 }
 0x184   : > { %v1537_v50 = vpack.c.bf16 %v1047_v42, %v1046_v36  ;;  %v1553_v51 = vpack.c.bf16 %v1079_v43, %v1078_v37  ;;  %v1049_v52 = vadd.f32 %v2079_v39, %v722_v48  ;;  %v1081_v53 = vadd.f32 %v2079_v39, %v802_v49 }
 0x186   : > { %1290 = vst [vmem:[%s2090_s11 + $0x60] sm:$0xff] %v1537_v50  ;;  %1306 = vst [vmem:[%s2090_s11 + $0xe0] sm:$0xff] %v1553_v51  ;;  %v1538_v54 = vpack.c.bf16 %v1049_v52, %v1048_v46  ;;  %v1554_v55 = vpack.c.bf16 %v1081_v53, %v1080_v47 }
 0x188   : > { %1291 = vst [vmem:[%s2090_s11 + $0x68] sm:$0xff] %v1538_v54  ;;  %1307 = vst [vmem:[%s2090_s11 + $0xe8] sm:$0xff] %v1554_v55  ;;  %v726_v56 = vpop.f32.mrb[28].mxu0  ;;  %v806_v57 = vpop.f32.mrb[28].mxu1 }
 0x189   : > { %v1050_v58 = vadd.f32 %v2077_v38, %v726_v56  ;;  %v1082_v59 = vadd.f32 %v2077_v38, %v806_v57  ;;  %v728_v60 = vpop.f32.mrb[29].mxu0  ;;  %v808_v61 = vpop.f32.mrb[29].mxu1 }
 0x18a   : > { %v1051_v62 = vadd.f32 %v2079_v39, %v728_v60  ;;  %v1083_v63 = vadd.f32 %v2079_v39, %v808_v61  ;;  %v730_v0 = vpop.f32.mrb[30].mxu0  ;;  %v810_v1 = vpop.f32.mrb[30].mxu1 }
 0x18b   : > { %v1052_v2 = vadd.f32 %v2077_v38, %v730_v0  ;;  %v1084_v3 = vadd.f32 %v2077_v38, %v810_v1  ;;  %v732_v4 = vpop.f32.mrb[31].mxu0  ;;  %v812_v5 = vpop.f32.mrb[31].mxu1 }
 0x18c   : > { %v1539_v6 = vpack.c.bf16 %v1051_v62, %v1050_v58  ;;  %v1555_v7 = vpack.c.bf16 %v1083_v63, %v1082_v59  ;;  %v1053_v8 = vadd.f32 %v2079_v39, %v732_v4  ;;  %v1085_v9 = vadd.f32 %v2079_v39, %v812_v5 }
 0x18e   : > { %1292 = vst [vmem:[%s2090_s11 + $0x70] sm:$0xff] %v1539_v6  ;;  %1308 = vst [vmem:[%s2090_s11 + $0xf0] sm:$0xff] %v1555_v7  ;;  %v1540_v38 = vpack.c.bf16 %v1053_v8, %v1052_v2  ;;  %v1556_v10 = vpack.c.bf16 %v1085_v9, %v1084_v3 }
 0x190   : > { %1293 = vst [vmem:[%s2090_s11 + $0x78] sm:$0xff] %v1540_v38  ;;  %1309 = vst [vmem:[%s2090_s11 + $0xf8] sm:$0xff] %v1556_v10 }
 0x191   : > { %1767 = shalt.err (!%p1764_p0)
}
 0x192   : > { %s1768_s4 = scalar_lea.hbm %s2181_s27, 4096  ;;  %s1772_s25 = scalar_lea.hbm %s2239_s3, 8192 }
 0x193   : > { %p1769_p2 = scmp.ne.s32.totalorder %s2181_s27, %s1768_s4  ;;  %p1773_p5 = scmp.lt.u32.totalorder %s2181_s27, %s2239_s3 }
 0x194   : > { %p1774_p8 = scmp.lt.u32.totalorder %s1772_s25, %s1768_s4  ;;  %p1776_p11 = scmp.lt.u32.totalorder %s1768_s4, %s2181_s27 }
 0x195   : > { %p1770_p7 = pnand %p1769_p2, %p2258_p13 }
 0x196   : > { %p1775_p9 = por %p1774_p8, %p1773_p5 }
 0x197   : > { %p1771_p12 = pneg %p1770_p7 }
 0x198   : > { %p1777_p4 = por %p1776_p11, %p1775_p9 }
 0x19a   : > { %p1778_p1 = pnand %p1777_p4, %p1771_p12 }
 0x19c   : > { %1781 = shalt.err (!%p1778_p1)
}
 0x19d   : > { %s1851_s11 = smov 128   ;;  %s1852_s19 = smov 256  }
 0x19e   : > { %s1853_s15 = smov 8  }
 0x19f   : > { %1580 = dma.vmem_to_hbm [thread:$0]  (%p2258_p13), %s2183_s5, 4096, %s2181_s27, %s1311_s21, %s1851_s11, %s1852_s19, %s1853_s15  }
 0x1a0 PF: > { %s1342_s10 = sand.u32 1, %s1820_s12   ;;  %p2259_p10 = scmp.ne.s32.totalorder %s2250_s24, 0 }
 0x1a1   : > { %p2260_p3 = scmp.ge.s32.totalorder %s1840_s17, 2  ;;  %s1343_s26 = scalar_lea.sflag [#allocation5], %s1342_s10 }
 0x1a3   : > { %p1591_p6 = pnand %p2260_p3, %p2259_p10 }
 0x1a5   : > { %1815 = dma.done.wait (!%p1591_p6), %s1343_s26, 4096  }
 0x1a6   : > { %1817 = vsyncadd (!%p1591_p6), %s1343_s26, 4294963200  ;;  %s20_s17 = sadd.s32 1, %s1840_s17   ;;  %s2261_s12 = smov %s1824_s13 }
 0x1a7   : > { %p17_p0 = scmp.ge.s32.totalorder %s20_s17, 4   ;;  %s2262_s13 = smov %s1828_s14 }
 0x1a8   : > { %s2263_s14 = smov %s1992_s18  ;;  %s2264_s15 = smov %s1836_s16 }
 0x1a9   : > { %s2265_s16 = smov %s2267_s30  ;;  %19 = sbr.rel (!%p17_p0) target bundleno = 7 (0x7), region = 94 }
 0x1b0   :  { %1348 = vsyncpa [#allocation4], 1 }
 0x1b1   :  { %1350 = vsyncpa [#allocation4 + $0x1], 1 }
 0x1b2   :  { %1351 = vsyncpa [#allocation7], 1 }
 0x1b3   :  { %1353 = vsyncpa [#allocation7 + $0x1], 1 }
 0x1b4   :  { %1354 = vsyncpa [#allocation5], 1 }
 0x1b5   :  { %1356 = vsyncpa [#allocation5 + $0x1], 1 }

</bundles_post_ra>
